<compile_context>
chip_gen: v6e
topology: v6e:2x2x1
jax: 0.10.0
libtpu: 0.0.40
codegen_flags: <defaults>
</compile_context>

<pallas_src>
import functools

import jax
import jax.numpy as jnp
from jax.experimental import pallas as pl
from jax.experimental.pallas import tpu as pltpu

LANE = 128
SUBLANE = 8


def _round_up(x, m):
    return (x + m - 1) // m * m


def actor_kernel(state_ref, w1_ref, b1_ref, w2_ref, b2_ref, w3_ref, b3_ref,
                 out_ref, *, max_action):
    # Three fused MXU matmuls (bf16 in, f32 accumulate) + f32 VPU relu /
    # f32 EUP tanh.  Weights are VMEM-resident (constant index maps); only
    # the state tile streams in and the (tb, A) action tile streams out.
    x = state_ref[...].astype(jnp.bfloat16)                       # cast in-kernel (free)

    h = jnp.dot(x, w1_ref[...], preferred_element_type=jnp.float32) + b1_ref[...]
    h = jnp.maximum(h, 0.0)                                        # f32 ReLU

    h = jnp.dot(h.astype(jnp.bfloat16), w2_ref[...],
                preferred_element_type=jnp.float32) + b2_ref[...]
    h = jnp.maximum(h, 0.0)

    h = jnp.dot(h.astype(jnp.bfloat16), w3_ref[...],
                preferred_element_type=jnp.float32) + b3_ref[...]  # (tb, A)
    out_ref[...] = (max_action * jnp.tanh(h)).astype(out_ref.dtype)


def prepare_actor_params(params):
    """One-time (init-time) pad + bf16 cast so the per-call hot path is only
    the kernel itself.  Hidden dim padded to 128 lanes; action dim left
    unpadded so the output is lane-minimal."""
    w1, b1, w2, b2, w3, b3 = params
    S, H = w1.shape
    A = w3.shape[1]
    Hp = _round_up(H, LANE)

    w1p = jnp.pad(w1, ((0, 0), (0, Hp - H))).astype(jnp.bfloat16)          # (S, Hp)
    w2p = jnp.pad(w2, ((0, Hp - H), (0, Hp - H))).astype(jnp.bfloat16)     # (Hp, Hp)
    w3p = jnp.pad(w3, ((0, Hp - H), (0, 0))).astype(jnp.bfloat16)          # (Hp, A)
    b1p = jnp.pad(b1.reshape(1, -1), ((0, 0), (0, Hp - H))).astype(jnp.float32)
    b2p = jnp.pad(b2.reshape(1, -1), ((0, 0), (0, Hp - H))).astype(jnp.float32)
    b3p = b3.reshape(1, -1).astype(jnp.float32)                            # (1, A)
    return (w1p, b1p, w2p, b2p, w3p, b3p)


def actor_forward(state, prepared_params, max_action, *, tile_b_max=2048):
    """state: (B, state_dim) float32.  prepared_params from prepare_actor_params.
    Returns (B, action_dim) float32."""
    w1p, b1p, w2p, b2p, w3p, b3p = prepared_params
    B, S = state.shape
    Hp = w1p.shape[1]
    A = w3p.shape[1]

    # Adaptive batch tiling: big tiles (amortize ~0.35us/step pipeline
    # overhead), minimal padding (fit tb to B), and >=2 grid steps when there
    # are enough rows so v7x can shard the "parallel" axis across both TCs.
    n_tiles = max(pl.cdiv(B, tile_b_max), 1)
    if B >= 2 * SUBLANE:
        n_tiles = max(n_tiles, 2)
    tb = _round_up(pl.cdiv(B, n_tiles), SUBLANE)
    Bp = _round_up(B, tb)
    grid = (Bp // tb,)

    # Pad batch only when needed; state stays f32 (cast happens in-kernel).
    state_p = state if Bp == B else jnp.pad(state, ((0, Bp - B), (0, 0)))

    flops = 2 * Bp * (S * Hp + Hp * Hp + Hp * A)
    transcendentals = Bp * A
    bytes_accessed = (
        Bp * S * 4                                  # state reads (f32)
        + (S * Hp + Hp * Hp + Hp * A) * 2           # weights (bf16, read once)
        + (Hp + Hp + A) * 4                         # biases (f32)
        + Bp * A * 4                                # output writes (f32, unpadded)
    )

    out = pl.pallas_call(
        functools.partial(actor_kernel, max_action=float(max_action)),
        out_shape=jax.ShapeDtypeStruct((Bp, A), jnp.float32),
        grid=grid,
        in_specs=[
            pl.BlockSpec((tb, S), lambda i: (i, 0)),       # state: streams per step
            pl.BlockSpec((S, Hp), lambda i: (0, 0)),       # weights/biases: resident
            pl.BlockSpec((1, Hp), lambda i: (0, 0)),
            pl.BlockSpec((Hp, Hp), lambda i: (0, 0)),
            pl.BlockSpec((1, Hp), lambda i: (0, 0)),
            pl.BlockSpec((Hp, A), lambda i: (0, 0)),
            pl.BlockSpec((1, A), lambda i: (0, 0)),
        ],
        out_specs=pl.BlockSpec((tb, A), lambda i: (i, 0)),  # lane-minimal output
        compiler_params=pltpu.CompilerParams(
            dimension_semantics=("parallel",),              # dual-TC sharding on v7x
            vmem_limit_bytes=32 * 1024 * 1024,              # safe on v5e/v6e/v7x
        ),
        cost_estimate=pl.CostEstimate(
            flops=flops,
            transcendentals=transcendentals,
            bytes_accessed=bytes_accessed,
        ),
    )(state_p, w1p, b1p, w2p, b2p, w3p, b3p)

    return out if Bp == B else out[:B]


def init_actor_params(key, state_dim, action_dim, hidden=64):
    """Deterministic init mimicking torch.nn.Linear default:
    U(-1/sqrt(fan_in), 1/sqrt(fan_in)). Weights stored as (in, out)."""
    def linear(k, fan_in, fan_out):
        kw, kb = jax.random.split(k)
        bound = 1.0 / jnp.sqrt(fan_in)
        w = jax.random.uniform(kw, (fan_in, fan_out), jnp.float32, -bound, bound)
        b = jax.random.uniform(kb, (1, fan_out), jnp.float32, -bound, bound)
        return w, b

    k1, k2, k3 = jax.random.split(key, 3)
    w1, b1 = linear(k1, state_dim, hidden)
    w2, b2 = linear(k2, hidden, hidden)
    w3, b3 = linear(k3, hidden, action_dim)
    return (w1, b1, w2, b2, w3, b3)


def actor_forward_ref(state, params, max_action):
    w1, b1, w2, b2, w3, b3 = params
    a = jnp.maximum(state @ w1 + b1, 0.0)
    a = jnp.maximum(a @ w2 + b2, 0.0)
    return max_action * jnp.tanh(a @ w3 + b3)


if __name__ == "__main__":
    state_dim = 16
    action_dim = 8
    max_action = 2.0

    key = jax.random.PRNGKey(0)
    k_params, k_small, k_big = jax.random.split(key, 3)
    params = init_actor_params(k_params, state_dim, action_dim)
    prepared = prepare_actor_params(params)     # one-time, outside the hot path

    # Small deployment-like shape (B=2): single 8-row tile internally.
    state_small = jax.random.normal(k_small, (2, state_dim), jnp.float32)
    out_small = jax.block_until_ready(
        actor_forward(state_small, prepared, max_action))
    ref_small = actor_forward_ref(state_small, params, max_action)
    assert out_small.shape == (2, action_dim)
    # bf16 matmul operands (f32 accumulate) -> loose tolerance vs f32 reference.
    assert jnp.allclose(out_small, ref_small, atol=5e-2, rtol=5e-2), \
        "mismatch vs JAX reference (small batch)"

    # Larger non-power-of-two batch exercising a multi-step pipelined grid
    # (B=300 -> tb=152, Bp=304: minimal padding, 2 parallel grid steps).
    state_big = jax.random.normal(k_big, (300, state_dim), jnp.float32)
    out_big = jax.block_until_ready(
        actor_forward(state_big, prepared, max_action))
    ref_big = actor_forward_ref(state_big, params, max_action)
    assert out_big.shape == (300, action_dim)
    assert jnp.allclose(out_big, ref_big, atol=5e-2, rtol=5e-2), \
        "mismatch vs JAX reference (large batch)"

    print("KERNEL_OK")
</pallas_src>

<mosaic_0001>
module attributes {stable_mosaic.version = 11 : i64} {
  func.func @actor_kernel(%arg0: i32, %arg1: memref<8x16xf32, #tpu.memory_space<vmem>>, %arg2: memref<16x128xbf16, #tpu.memory_space<vmem>>, %arg3: memref<1x128xf32, #tpu.memory_space<vmem>>, %arg4: memref<128x128xbf16, #tpu.memory_space<vmem>>, %arg5: memref<1x128xf32, #tpu.memory_space<vmem>>, %arg6: memref<128x8xbf16, #tpu.memory_space<vmem>>, %arg7: memref<1x8xf32, #tpu.memory_space<vmem>>, %arg8: memref<8x8xf32, #tpu.memory_space<vmem>>) attributes {dimension_semantics = [#tpu.dimension_semantics<parallel>], iteration_bounds = array<i64: 1>, scalar_prefetch = 0 : i64, scratch_operands = 0 : i64, tpu.core_type = #tpu.core_type<tc>, window_params = [{transform_indices = @transform_0, window_bounds = array<i64: 8, 16>}, {pipeline_mode = #tpu.pipeline_mode<synchronous>, transform_indices = @transform_1, window_bounds = array<i64: 16, 128>}, {pipeline_mode = #tpu.pipeline_mode<synchronous>, transform_indices = @transform_2, window_bounds = array<i64: 1, 128>}, {pipeline_mode = #tpu.pipeline_mode<synchronous>, transform_indices = @transform_3, window_bounds = array<i64: 128, 128>}, {pipeline_mode = #tpu.pipeline_mode<synchronous>, transform_indices = @transform_4, window_bounds = array<i64: 1, 128>}, {pipeline_mode = #tpu.pipeline_mode<synchronous>, transform_indices = @transform_5, window_bounds = array<i64: 128, 8>}, {pipeline_mode = #tpu.pipeline_mode<synchronous>, transform_indices = @transform_6, window_bounds = array<i64: 1, 8>}, {transform_indices = @transform_7, window_bounds = array<i64: 8, 8>}]} {
    %c0 = arith.constant 0 : index
    %c0_0 = arith.constant 0 : index
    %0 = vector.load %arg1[%c0, %c0_0] : memref<8x16xf32, #tpu.memory_space<vmem>>, vector<8x16xf32>
    %1 = arith.truncf %0 : vector<8x16xf32> to vector<8x16xbf16>
    %c0_1 = arith.constant 0 : index
    %c0_2 = arith.constant 0 : index
    %2 = vector.load %arg2[%c0_1, %c0_2] : memref<16x128xbf16, #tpu.memory_space<vmem>>, vector<16x128xbf16>
    %cst = arith.constant dense<0.000000e+00> : vector<8x128xf32>
    %3 = tpu.matmul %1, %2, %cst {dimension_numbers = #tpu.dot_dimension_numbers<[1], [0], [0], [1], [0, 0, 1, 1], [], []>} : vector<8x16xbf16>, vector<16x128xbf16>, vector<8x128xf32> -> vector<8x128xf32>
    %c0_3 = arith.constant 0 : index
    %c0_4 = arith.constant 0 : index
    %4 = vector.load %arg3[%c0_3, %c0_4] : memref<1x128xf32, #tpu.memory_space<vmem>>, vector<1x128xf32>
    %5 = vector.broadcast %4 : vector<1x128xf32> to vector<8x128xf32>
    %6 = arith.addf %3, %5 : vector<8x128xf32>
    %cst_5 = arith.constant 0.000000e+00 : f32
    %7 = vector.broadcast %cst_5 : f32 to vector<8x128xf32>
    %8 = arith.maximumf %6, %7 : vector<8x128xf32>
    %9 = arith.truncf %8 : vector<8x128xf32> to vector<8x128xbf16>
    %c0_6 = arith.constant 0 : index
    %c0_7 = arith.constant 0 : index
    %10 = vector.load %arg4[%c0_6, %c0_7] : memref<128x128xbf16, #tpu.memory_space<vmem>>, vector<128x128xbf16>
    %cst_8 = arith.constant dense<0.000000e+00> : vector<8x128xf32>
    %11 = tpu.matmul %9, %10, %cst_8 {dimension_numbers = #tpu.dot_dimension_numbers<[1], [0], [0], [1], [0, 0, 1, 1], [], []>} : vector<8x128xbf16>, vector<128x128xbf16>, vector<8x128xf32> -> vector<8x128xf32>
    %c0_9 = arith.constant 0 : index
    %c0_10 = arith.constant 0 : index
    %12 = vector.load %arg5[%c0_9, %c0_10] : memref<1x128xf32, #tpu.memory_space<vmem>>, vector<1x128xf32>
    %13 = vector.broadcast %12 : vector<1x128xf32> to vector<8x128xf32>
    %14 = arith.addf %11, %13 : vector<8x128xf32>
    %cst_11 = arith.constant 0.000000e+00 : f32
    %15 = vector.broadcast %cst_11 : f32 to vector<8x128xf32>
    %16 = arith.maximumf %14, %15 : vector<8x128xf32>
    %17 = arith.truncf %16 : vector<8x128xf32> to vector<8x128xbf16>
    %c0_12 = arith.constant 0 : index
    %c0_13 = arith.constant 0 : index
    %18 = vector.load %arg6[%c0_12, %c0_13] : memref<128x8xbf16, #tpu.memory_space<vmem>>, vector<128x8xbf16>
    %cst_14 = arith.constant dense<0.000000e+00> : vector<8x8xf32>
    %19 = tpu.matmul %17, %18, %cst_14 {dimension_numbers = #tpu.dot_dimension_numbers<[1], [0], [0], [1], [0, 0, 1, 1], [], []>} : vector<8x128xbf16>, vector<128x8xbf16>, vector<8x8xf32> -> vector<8x8xf32>
    %c0_15 = arith.constant 0 : index
    %c0_16 = arith.constant 0 : index
    %20 = vector.load %arg7[%c0_15, %c0_16] : memref<1x8xf32, #tpu.memory_space<vmem>>, vector<1x8xf32>
    %21 = vector.broadcast %20 : vector<1x8xf32> to vector<8x8xf32>
    %22 = arith.addf %19, %21 : vector<8x8xf32>
    %23 = math.tanh %22 : vector<8x8xf32>
    %cst_17 = arith.constant 2.000000e+00 : f32
    %24 = vector.broadcast %cst_17 : f32 to vector<8x8xf32>
    %25 = arith.mulf %24, %23 : vector<8x8xf32>
    %c0_18 = arith.constant 0 : index
    %c0_19 = arith.constant 0 : index
    %26 = vector.load %arg8[%c0_18, %c0_19] : memref<8x8xf32, #tpu.memory_space<vmem>>, vector<8x8xf32>
    tpu.vector_store %arg8[%c0_18, %c0_19], %25 {strides = array<i32>} : memref<8x8xf32, #tpu.memory_space<vmem>>, vector<8x8xf32>,
    return
  }
  func.func @transform_0(%arg0: i32) -> (i32, i32) {
    %c0_i32 = arith.constant 0 : i32
    %c0_i32_0 = arith.constant 0 : i32
    return %arg0, %c0_i32 : i32, i32
  }
  func.func @transform_1(%arg0: i32) -> (i32, i32) {
    %c0_i32 = arith.constant 0 : i32
    %c0_i32_0 = arith.constant 0 : i32
    %c0_i32_1 = arith.constant 0 : i32
    return %c0_i32, %c0_i32_0 : i32, i32
  }
  func.func @transform_2(%arg0: i32) -> (i32, i32) {
    %c0_i32 = arith.constant 0 : i32
    %c0_i32_0 = arith.constant 0 : i32
    %c0_i32_1 = arith.constant 0 : i32
    return %c0_i32, %c0_i32_0 : i32, i32
  }
  func.func @transform_3(%arg0: i32) -> (i32, i32) {
    %c0_i32 = arith.constant 0 : i32
    %c0_i32_0 = arith.constant 0 : i32
    %c0_i32_1 = arith.constant 0 : i32
    return %c0_i32, %c0_i32_0 : i32, i32
  }
  func.func @transform_4(%arg0: i32) -> (i32, i32) {
    %c0_i32 = arith.constant 0 : i32
    %c0_i32_0 = arith.constant 0 : i32
    %c0_i32_1 = arith.constant 0 : i32
    return %c0_i32, %c0_i32_0 : i32, i32
  }
  func.func @transform_5(%arg0: i32) -> (i32, i32) {
    %c0_i32 = arith.constant 0 : i32
    %c0_i32_0 = arith.constant 0 : i32
    %c0_i32_1 = arith.constant 0 : i32
    return %c0_i32, %c0_i32_0 : i32, i32
  }
  func.func @transform_6(%arg0: i32) -> (i32, i32) {
    %c0_i32 = arith.constant 0 : i32
    %c0_i32_0 = arith.constant 0 : i32
    %c0_i32_1 = arith.constant 0 : i32
    return %c0_i32, %c0_i32_0 : i32, i32
  }
  func.func @transform_7(%arg0: i32) -> (i32, i32) {
    %c0_i32 = arith.constant 0 : i32
    %c0_i32_0 = arith.constant 0 : i32
    return %arg0, %c0_i32 : i32, i32
  }
}

</mosaic_0001>

<bundles_post_ra>
// kernel: tpu_custom_call.1
= control target key start
LH: loop header
LB: loop body
LE: loop exit
PB: predicated region body
PF: predicated region fallthrough
CT: control target
= control target key end

     0   :  { %12 = vsyncpa [#allocation3], 0  ;;  %s673_s0 = inlined_call_operand.vmem [shape: f32[8,16], index: 0, kind: input, shape index: {}]   ;;  %s674_s1 = inlined_call_operand.hbm [shape: bf16[16,128], index: 1, kind: input, shape index: {}]   ;;  %s675_s2 = inlined_call_operand.vmem [shape: f32[1,128], index: 2, kind: input, shape index: {}]   ;;  %s676_s3 = inlined_call_operand.vmem [shape: bf16[128,128], index: 3, kind: input, shape index: {}]   ;;  %s677_s4 = inlined_call_operand.hbm [shape: f32[1,128], index: 4, kind: input, shape index: {}]   ;;  %s678_s5 = inlined_call_operand.vmem [shape: bf16[128,8], index: 5, kind: input, shape index: {}]   ;;  %s679_s6 = inlined_call_operand.vmem [shape: f32[1,8], index: 6, kind: input, shape index: {}]   ;;  %s680_s7 = inlined_call_operand.hbm [shape: f32[8,8], index: 7, kind: output, shape index: {}]  }
   0x1   :  { %13 = vsyncpa [#allocation6], 0 }
   0x2   :  { %14 = vsyncpa [#allocation4], 0  ;;  %s540_s24 = smov [#allocation2]  }
   0x3   :  { %s22_s25 = sshll.u32 %s540_s24, 4  ;;  %s23_s25 = int_to_ptr.vmem [resolvable:$true] %s22_s25 }
   0x4   :  { %s482_s26 = scalar_lea.vmem %s23_s25, 128  ;;  %p487_p1 = scmp.lt.s32.totalorder %s23_s25, %s23_s25 }
   0x5   :  { %p483_p0 = scmp.ne.s32.totalorder %s23_s25, %s482_s26  ;;  %p488_p2 = scmp.lt.s32.totalorder %s482_s26, %s482_s26 }
   0x7   :  { %p489_p3 = por %p488_p2, %p487_p1 }
   0x9   :  { %p490_p4 = pnand %p489_p3, %p483_p0 }
   0xb   :  { %493 = shalt.err (!%p490_p4)
}
   0xc   :  { %s541_s27 = smov 64   ;;  %s542_s28 = smov 4  }
   0xd   :  { %28 = dma.hbm_to_vmem [thread:$0]  %s674_s1, 128, %s23_s25, [#allocation3], %s541_s27, %s541_s27, %s542_s28  }
   0xe   :  { %s543_s8 = smov [#allocation5]  }
   0xf   :  { %s39_s9 = sshll.u32 %s543_s8, 4  ;;  %s40_s9 = int_to_ptr.vmem [resolvable:$true] %s39_s9 }
  0x10   :  { %s502_s10 = scalar_lea.vmem %s40_s9, 16  ;;  %s506_s11 = scalar_lea.vmem %s40_s9, 32 }
  0x11   :  { %p503_p5 = scmp.ne.s32.totalorder %s40_s9, %s502_s10  ;;  %p507_p6 = scmp.lt.s32.totalorder %s40_s9, %s40_s9 }
  0x12   :  { %p508_p7 = scmp.lt.s32.totalorder %s506_s11, %s502_s10 }
  0x14   :  { %p509_p8 = por %p508_p7, %p507_p6 }
  0x16   :  { %p510_p9 = pnand %p509_p8, %p503_p5 }
  0x18   :  { %513 = shalt.err (!%p510_p9)
}
  0x19   :  { %42 = dma.hbm_to_vmem [thread:$0]  %s677_s4, 16, %s40_s9, [#allocation6]  }
  0x1a   :  { %534 = dma.done.wait [#allocation3], 128  }
  0x1b   :  { %535 = vsyncadd [#allocation3], 4294967168 }
  0x1c   :  { %536 = dma.done.wait [#allocation6], 16  }
  0x1d   :  { %537 = vsyncadd [#allocation6], 4294967280  ;;  %v544_v0 = vmov 0.0   ;;  %vm545_vm0 = vmmov 0   ;;  %v455_v1 = vld [vmem:[#allocation2] sm:$0xff]   ;;  %vm71_vm1 = vcmask 130048  }
  0x1e   :  { %402 = vmatprep.subr.bf16.mxu0 %v544_v0  ;;  %404 = vmatprep.mubr.msk.bf16.mxu0 %vm545_vm0, %v544_v0  ;;  %v54_v2 = vld [vmem:[%s673_s0] sm:$0xff]  ;;  %v456_v4 = vld [vmem:[%s676_s3 + $0x38] sm:$0xff]   ;;  %v457_v5 = vld [vmem:[%s676_s3 + $0x30] sm:$0xff]   ;;  %vm343_vm2 = vcmask 64512  }
  0x1f   :  { %408 = vmatprep.subr.bf16.mxu1 %v544_v0  ;;  %424 = vmatprep.mubr.msk.bf16.mxu1 %vm545_vm0, %v544_v0  ;;  %v55_v3 = vpack.c.bf16 %v54_v2, %v54_v2  ;;  %v458_v6 = vld [vmem:[%s676_s3 + $0x28] sm:$0xff]   ;;  %v459_v7 = vld [vmem:[%s676_s3 + $0x20] sm:$0xff]   ;;  %v460_v8 = vld [vmem:[%s676_s3 + $0x18] sm:$0xff]  }
  0x20   :  { %403 = vmatpush3.bf16.msra.mxu0 %v455_v1  ;;  %409 = vmatpush3.bf16.msra.mxu1 %v456_v4  ;;  %v461_v9 = vld [vmem:[%s676_s3 + $0x10] sm:$0xff]   ;;  %v462_v10 = vld [vmem:[%s676_s3 + $0x8] sm:$0xff]   ;;  %v463_v11 = vld [vmem:[%s676_s3] sm:$0xff]  }
  0x21   :  { %428 = vmatprep.subr.bf16.mxu0 %v544_v0  ;;  %410 = vmatprep.subr.bf16.mxu1 %v544_v0  ;;  %v464_v12 = vld [vmem:[%s678_s5 + $0x38] sm:$0xff]   ;;  %v465_v13 = vld [vmem:[%s678_s5 + $0x30] sm:$0xff]   ;;  %v466_v14 = vld [vmem:[%s678_s5 + $0x28] sm:$0xff]  }
  0x22   :  { %v467_v15 = vld [vmem:[%s678_s5 + $0x20] sm:$0xff]   ;;  %v468_v16 = vld [vmem:[%s678_s5 + $0x18] sm:$0xff]   ;;  %v469_v17 = vld [vmem:[%s678_s5 + $0x10] sm:$0xff]  }
  0x23   :  { %405 = vmatmul.mubr.msk.bf16.vlgmr.msra.gmra.mxu0 %vm71_vm1, %v55_v3  ;;  %v361_v18 = vld [vmem:[%s675_s2] ss:$0 sm:$0xff]  ;;  %v470_v26 = vld [vmem:[%s678_s5 + $0x8] sm:$0xff]  }
  0x24   :  { %444 = vmatprep.mubr.msk.bf16.mxu0 %vm545_vm0, %v544_v0  ;;  %411 = vmatpush3.bf16.msra.mxu1 %v457_v5  ;;  %v471_v27 = vld [vmem:[%s678_s5] sm:$0xff]   ;;  %v364_v28 = vld [vmem:[#allocation5] ss:$0 sm:$0xff]  ;;  %s546_s5 = smov [#allocation7]  }
  0x25   :  { %412 = vmatprep.subr.bf16.mxu1 %v544_v0  ;;  %429 = vmatpush3.bf16.msra.mxu0 %v464_v12  ;;  %v373_v36 = vld [vmem:[%s679_s6] ss:$0 sm:$0xff]  ;;  %s351_s21 = sshll.u32 %s546_s5, 4  ;;  %s352_s21 = int_to_ptr.vmem [resolvable:$true] %s351_s21 }
  0x26   :  { %430 = vmatprep.subr.bf16.mxu0 %v544_v0  ;;  %s514_s22 = scalar_lea.vmem %s352_s21, 128  ;;  %p519_p11 = scmp.lt.s32.totalorder %s352_s21, %s352_s21 }
  0x27   :  { %p515_p10 = scmp.ne.s32.totalorder %s352_s21, %s514_s22  ;;  %p520_p12 = scmp.lt.s32.totalorder %s514_s22, %s514_s22 }
  0x28   :  { %413 = vmatpush3.bf16.msra.mxu1 %v458_v6 }
  0x29   :  { %414 = vmatprep.subr.bf16.mxu1 %v544_v0  ;;  %431 = vmatpush3.bf16.msra.mxu0 %v465_v13  ;;  %p521_p13 = por %p520_p12, %p519_p11 }
  0x2a   :  { %432 = vmatprep.subr.bf16.mxu0 %v544_v0 }
  0x2b   :  { %p522_p0 = pnand %p521_p13, %p515_p10 }
  0x2c   :  { %415 = vmatpush3.bf16.msra.mxu1 %v459_v7 }
  0x2d   :  { %416 = vmatprep.subr.bf16.mxu1 %v544_v0  ;;  %433 = vmatpush3.bf16.msra.mxu0 %v466_v14 }
  0x2e   :  { %434 = vmatprep.subr.bf16.mxu0 %v544_v0 }
  0x30   :  { %417 = vmatpush3.bf16.msra.mxu1 %v460_v8 }
  0x31   :  { %418 = vmatprep.subr.bf16.mxu1 %v544_v0  ;;  %435 = vmatpush3.bf16.msra.mxu0 %v467_v15 }
  0x32   :  { %436 = vmatprep.subr.bf16.mxu0 %v544_v0 }
  0x34   :  { %419 = vmatpush3.bf16.msra.mxu1 %v461_v9 }
  0x35   :  { %420 = vmatprep.subr.bf16.mxu1 %v544_v0  ;;  %437 = vmatpush3.bf16.msra.mxu0 %v468_v16 }
  0x36   :  { %438 = vmatprep.subr.bf16.mxu0 %v544_v0 }
  0x38   :  { %421 = vmatpush3.bf16.msra.mxu1 %v462_v10 }
  0x39   :  { %422 = vmatprep.subr.bf16.mxu1 %v544_v0  ;;  %439 = vmatpush3.bf16.msra.mxu0 %v469_v17 }
  0x3a   :  { %440 = vmatprep.subr.bf16.mxu0 %v544_v0 }
  0x3c   :  { %423 = vmatpush3.bf16.msra.mxu1 %v463_v11 }
  0x3d   :  { %441 = vmatpush3.bf16.msra.mxu0 %v470_v26 }
  0x3e   :  { %442 = vmatprep.subr.bf16.mxu0 %v544_v0 }
  0x41   :  { %443 = vmatpush3.bf16.msra.mxu0 %v471_v27 }
  0xe3   :  { %v109_v19 = vpop.f32.mrf.mxu0 }
  0xe4   :  { %v110_v20 = vadd.f32 %v361_v18, %v109_v19 }
  0xe5   :  { %v406_v21 = vpop.f32.mrf.mxu0 }
  0xe6   :  { %v115_v22 = vmax.f32 %v110_v20, 0.0 }
  0xe7   :  { %v112_v23 = vpop.f32.mrf.mxu0 }
  0xe8   :  { %v116_v24 = vpack.c.bf16 %v115_v22, %v115_v22 }
  0xe9   :  { %v407_v25 = vpop.f32.mrf.mxu0 }
  0xea   :  { %425 = vmatmul.mubr.bf16.vlgmr.msra.gmra.mxu1 %v116_v24 }
 0x1aa   :  { %v222_v29 = vpop.f32.mrf.mxu1 }
 0x1ab   :  { %v223_v30 = vadd.f32 %v364_v28, %v222_v29 }
 0x1ac   :  { %v426_v31 = vpop.f32.mrf.mxu1 }
 0x1ad   :  { %v228_v32 = vmax.f32 %v223_v30, 0.0 }
 0x1ae   :  { %v225_v33 = vpop.f32.mrf.mxu1 }
 0x1af   :  { %v229_v34 = vpack.c.bf16 %v228_v32, %v228_v32 }
 0x1b0   :  { %v427_v35 = vpop.f32.mrf.mxu1 }
 0x1b1   :  { %445 = vmatmul.mubr.bf16.vlgmr.msra.gmra.mxu0 %v229_v34 }
 0x271   :  { %v335_v37 = vpop.f32.mrf.mxu0 }
 0x272   :  { %v336_v38 = vadd.f32 %v373_v36, %v335_v37 }
 0x273   :  { %v446_v39 = vpop.f32.mrf.mxu0 }
 0x274   :  { %472 = vtanh.f32 %v336_v38 }
 0x275   :  { %v338_v40 = vpop.f32.mrf.mxu0 }
 0x277   :  { %v447_v41 = vpop.f32.mrf.mxu0 }
 0x281   :  { %v473_v42 = vpop.eup %472 }
 0x282   :  { %v342_v43 = vmul.f32 2.0, %v473_v42 }
 0x284   :  { %344 = vst.msk [vmem:[#allocation7] sm:$0xff] %vm343_vm2, %v342_v43 }
 0x285   :  { %525 = shalt.err (!%p522_p0)
}
 0x286   :  { %354 = dma.vmem_to_hbm [thread:$0]  %s352_s21, 128, %s680_s7, [#allocation4]  }
 0x287   :  { %538 = dma.done.wait [#allocation4], 128  }
 0x288   :  { %539 = vsyncadd [#allocation4], 4294967168 }
 0x289   :  { %358 = vsyncpa [#allocation3], 1 }
 0x28a   :  { %359 = vsyncpa [#allocation6], 1 }
 0x28b   :  { %360 = vsyncpa [#allocation4], 1 }

</bundles_post_ra>
